<compile_context>
chip_gen: v5e
topology: v5e:2x2
jax: 0.10.0
libtpu: 0.0.40
codegen_flags: <defaults>
</compile_context>

<pallas_src>
import math

import jax
import jax.numpy as jnp
from jax import lax
from jax.experimental import pallas as pl
from jax.experimental.pallas import tpu as pltpu


_NT = (((1,), (1,)), ((), ()))  # contract last dims of both operands: the "x @ W^T" form


def _lora_linear_kernel(scale_ref, x_ref, w_ref, b_ref, a_ref, up_ref,
                        o_ref, acc_ref, down_ref):
    """One (tm, tn) output tile, accumulated over the K (in_features) grid axis.

    scale_ref: (1,)       SMEM   LoRA scaling factor
    x_ref:     (tm, tk)          activations tile
    w_ref:     (tn, tk)          frozen base-weight tile (natural PyTorch layout)
    b_ref:     (1, tn)    f32    bias tile
    a_ref:     (rank, tk)        lora_down tile
    up_ref:    (tn, rank)        lora_up tile
    o_ref:     (tm, tn)          output tile
    acc_ref:   (tm, tn)   f32    scratch: base matmul accumulator
    down_ref:  (tm, rank) f32    scratch: LoRA down-projection accumulator
    """
    k = pl.program_id(2)

    @pl.when(k == 0)
    def _():
        acc_ref[...] = jnp.zeros_like(acc_ref)
        down_ref[...] = jnp.zeros_like(down_ref)

    x = x_ref[...]
    # Frozen base linear partial: x_tile @ W_tile^T  (f32 MXU accumulation).
    acc_ref[...] += lax.dot_general(x, w_ref[...], dimension_numbers=_NT,
                                    preferred_element_type=jnp.float32)
    # LoRA down partial: x_tile @ A_tile^T.
    # TODO(synk): this depends only on (i, k); it is redundantly recomputed once per
    # out_features tile (~rank/tn extra MXU work) — acceptable for small rank.
    down_ref[...] += lax.dot_general(x, a_ref[...], dimension_numbers=_NT,
                                     preferred_element_type=jnp.float32)

    @pl.when(k == pl.num_programs(2) - 1)
    def _():
        # Epilogue: scale, up-project, add bias, cast — only on the last K step.
        down = down_ref[...] * scale_ref[0]
        up = lax.dot_general(down.astype(up_ref.dtype), up_ref[...],
                             dimension_numbers=_NT,
                             preferred_element_type=jnp.float32)
        o_ref[...] = (acc_ref[...] + b_ref[...] + up).astype(o_ref.dtype)


def _round_up(n, m):
    return ((n + m - 1) // m) * m


def _nbytes(shape, dtype):
    return math.prod(shape) * jnp.dtype(dtype).itemsize


def _pick_tile(total, limit):
    """Largest tile <= limit dividing `total`; prefer 256-alignment (v6e/v7x MXU)."""
    limit = max(128, min(limit, total))
    for step in (256, 128):
        if total % step:
            continue
        t = (limit // step) * step
        while t >= step:
            if total % t == 0:
                return t
            t -= step
    return total


def _pick_k_tile(in_features, limit):
    """K tile: full in_features when small; else a large 128-multiple divisor; else
    a 128-multiple that the wrapper zero-pads the K axis to."""
    if in_features <= limit:
        return in_features
    t = (limit // 128) * 128
    while t >= 512:
        if in_features % t == 0:
            return t
        t -= 128
    return max(128, (limit // 128) * 128)


def _vmem_cap_bytes():
    """Generation-aware VMEM budget: physical capacity minus headroom."""
    try:
        cap = int(getattr(pltpu.get_tpu_info(), "vmem_capacity_bytes", 64 << 20))
    except Exception:
        cap = 64 << 20  # conservative: v7x has 64 MiB per TensorCore
    headroom = max(8 << 20, cap // 8)
    return max(cap - headroom, 16 << 20)


def lora_linear(x, w, b, lora_down_w, lora_up_w, scaling=1.0, *,
                tm=256, tn=512, tk=2048):
    """LoRALinear forward: y = x @ W^T + b + scaling * ((x @ A^T) @ B^T).

    x: (..., in_features) -> (..., out_features). tm/tn/tk are tile hints; they are
    grown/shrunk automatically to fit the current generation's VMEM.
    """
    out_features, in_features = w.shape
    rank = lora_down_w.shape[0]
    assert lora_up_w.shape == (out_features, rank)

    dt = x.dtype
    # MXU operands must share a dtype: cast the (frozen) weights to the activation dtype.
    w = w.astype(dt)
    lora_down_w = lora_down_w.astype(dt)
    lora_up_w = lora_up_w.astype(dt)
    if b is None:
        b = jnp.zeros((out_features,), dtype=jnp.float32)
    b2 = b.astype(jnp.float32).reshape(1, out_features)   # added to the f32 accumulator

    lead_shape = x.shape[:-1]
    x2 = x.reshape(-1, in_features)
    M = x2.shape[0]

    # ---- tile selection --------------------------------------------------------
    tm = max(8, min(_round_up(tm, 8), _round_up(M, 8)))   # ragged M: cdiv grid, no pad
    n_pad = _round_up(out_features, 128)                  # lane-dense output stores
    tn = _pick_tile(n_pad, tn)
    tk = _pick_k_tile(in_features, max(tk, 128))

    vmem_cap = _vmem_cap_bytes()

    def footprint(tm_, tn_, tk_):
        dbl = 2 * (_nbytes((tm_, tk_), dt)                    # x tile
                   + _nbytes((tn_, tk_), dt)                  # W tile
                   + _nbytes((8, tn_), jnp.float32)           # bias (sublane-padded)
                   + _nbytes((max(rank, 8), tk_), dt)         # lora_down tile
                   + _nbytes((tn_, 128), dt)                  # lora_up (lane-padded)
                   + _nbytes((tm_, tn_), dt))                 # output tile
        scratch = _nbytes((tm_, tn_), jnp.float32) + _nbytes((tm_, 128), jnp.float32)
        return dbl + scratch

    # Grow tn when plenty of VMEM is free (v5e/v6e: 128 MiB) — bigger lane-dense
    # tiles amortize the ~0.35 us per-step overhead and cut x re-reads.
    while tn < 1024 and n_pad % (tn * 2) == 0 and 4 * footprint(tm, tn * 2, tk) <= 3 * vmem_cap:
        tn *= 2

    # Shrink tiles until the double-buffered footprint fits the VMEM budget.
    while footprint(tm, tn, tk) > vmem_cap:
        if tk > 512:
            tk = max(512, ((tk // 2) // 128) * 128)
        elif tn > 128:
            tn = _pick_tile(n_pad, max(128, tn // 2))
        elif tm > 8:
            tm = max(8, _round_up(tm // 2, 8))
        elif tk > 128:
            tk = max(128, ((tk // 2) // 128) * 128)
        else:
            break

    # ---- padding (zeros: exact for the contraction; padded out-columns sliced off) --
    k_pad = _round_up(in_features, tk)
    pad_k = k_pad - in_features
    pad_n = n_pad - out_features
    if pad_k:
        x2 = jnp.pad(x2, ((0, 0), (0, pad_k)))
        lora_down_w = jnp.pad(lora_down_w, ((0, 0), (0, pad_k)))
    if pad_k or pad_n:
        w = jnp.pad(w, ((0, pad_n), (0, pad_k)))
    if pad_n:
        lora_up_w = jnp.pad(lora_up_w, ((0, pad_n), (0, 0)))
        b2 = jnp.pad(b2, ((0, 0), (0, pad_n)))

    m_tiles = pl.cdiv(M, tm)
    n_tiles = n_pad // tn
    k_tiles = k_pad // tk

    # Adaptive ordering of the two parallel axes: put the axis of the *smaller*
    # operand innermost so the larger one (usually W) is re-read the fewest times.
    m_outer = M >= out_features
    if m_outer:
        grid = (m_tiles, n_tiles, k_tiles)
        x_map    = lambda a, b_, k: (a, k)
        w_map    = lambda a, b_, k: (b_, k)
        bias_map = lambda a, b_, k: (0, b_)
        a_map    = lambda a, b_, k: (0, k)
        up_map   = lambda a, b_, k: (b_, 0)
        out_map  = lambda a, b_, k: (a, b_)
    else:
        grid = (n_tiles, m_tiles, k_tiles)
        x_map    = lambda a, b_, k: (b_, k)
        w_map    = lambda a, b_, k: (a, k)
        bias_map = lambda a, b_, k: (0, a)
        a_map    = lambda a, b_, k: (0, k)
        up_map   = lambda a, b_, k: (a, 0)
        out_map  = lambda a, b_, k: (b_, a)

    scale_arr = jnp.asarray([scaling], dtype=jnp.float32)

    out = pl.pallas_call(
        _lora_linear_kernel,
        out_shape=jax.ShapeDtypeStruct((M, n_pad), dt),
        grid_spec=pltpu.PrefetchScalarGridSpec(
            num_scalar_prefetch=0,
            grid=grid,
            in_specs=[
                pl.BlockSpec(memory_space=pltpu.MemorySpace.SMEM),  # scaling scalar
                pl.BlockSpec((tm, tk), x_map),                      # activations tile
                pl.BlockSpec((tn, tk), w_map),                      # W tile (natural layout)
                pl.BlockSpec((1, tn), bias_map),                    # bias tile (f32)
                pl.BlockSpec((rank, tk), a_map),                    # lora_down tile
                pl.BlockSpec((tn, rank), up_map),                   # lora_up tile
            ],
            out_specs=pl.BlockSpec((tm, tn), out_map),
            scratch_shapes=[
                pltpu.VMEM((tm, tn), jnp.float32),    # base accumulator
                pltpu.VMEM((tm, rank), jnp.float32),  # LoRA down accumulator
            ],
        ),
        compiler_params=pltpu.CompilerParams(
            dimension_semantics=("parallel", "parallel", "arbitrary"),
            vmem_limit_bytes=int(vmem_cap),
        ),
    )(scale_arr, x2, w, b2, lora_down_w, lora_up_w)

    if pad_n:
        out = out[:, :out_features]
    return out.reshape(*lead_shape, out_features)


if __name__ == "__main__":
    # Small shapes: batch=2, seq=8, in_features=32, out_features=32, rank=4
    batch, seq, in_features, out_features, rank = 2, 8, 32, 32, 4

    key = jax.random.PRNGKey(0)
    k_x, k_w, k_b, k_down, k_up = jax.random.split(key, 5)

    x = jax.random.normal(k_x, (batch, seq, in_features), dtype=jnp.float32)

    # Base linear (frozen): PyTorch default init — U(-1/sqrt(fan_in), 1/sqrt(fan_in))
    w_bound = 1.0 / math.sqrt(in_features)
    w = jax.random.uniform(k_w, (out_features, in_features),
                           minval=-w_bound, maxval=w_bound, dtype=jnp.float32)
    b = jax.random.uniform(k_b, (out_features,),
                           minval=-w_bound, maxval=w_bound, dtype=jnp.float32)
    # lora_down: kaiming_uniform(a=sqrt(5)) => same bound 1/sqrt(in_features)
    lora_down_w = jax.random.uniform(k_down, (rank, in_features),
                                     minval=-w_bound, maxval=w_bound, dtype=jnp.float32)

    def ref_fn(x, w, b, A, B, s):
        return (x @ w.T + b) + s * ((x @ A.T) @ B.T)

    # 1) Init-faithful: lora_up is zeros (nn.init.zeros_), scaling=1.0
    lora_up_zero = jnp.zeros((out_features, rank), dtype=jnp.float32)
    out = jax.block_until_ready(lora_linear(x, w, b, lora_down_w, lora_up_zero, 1.0))
    assert out.shape == (batch, seq, out_features)
    assert jnp.allclose(out, ref_fn(x, w, b, lora_down_w, lora_up_zero, 1.0),
                        atol=1e-5, rtol=1e-5)

    # 2) Exercise the LoRA path with a non-zero up-projection and non-unit scaling.
    lora_up_w = jax.random.uniform(k_up, (out_features, rank),
                                   minval=-0.5, maxval=0.5, dtype=jnp.float32)
    out2 = jax.block_until_ready(lora_linear(x, w, b, lora_down_w, lora_up_w, 0.5))
    assert jnp.allclose(out2, ref_fn(x, w, b, lora_down_w, lora_up_w, 0.5),
                        atol=1e-5, rtol=1e-5)

    # 3) Exercise the multi-tile path: K accumulation, several N tiles, ragged M,
    #    and the "out_features outer" grid ordering — still tiny shapes.
    M3, in3, out3 = 22, 256, 384
    kk = jax.random.split(jax.random.PRNGKey(1), 5)
    x3 = jax.random.normal(kk[0], (M3, in3), dtype=jnp.float32)
    w3 = jax.random.uniform(kk[1], (out3, in3), minval=-0.06, maxval=0.06, dtype=jnp.float32)
    b3 = jax.random.uniform(kk[2], (out3,), minval=-0.06, maxval=0.06, dtype=jnp.float32)
    a3 = jax.random.uniform(kk[3], (rank, in3), minval=-0.06, maxval=0.06, dtype=jnp.float32)
    u3 = jax.random.uniform(kk[4], (out3, rank), minval=-0.5, maxval=0.5, dtype=jnp.float32)
    out3_v = jax.block_until_ready(
        lora_linear(x3, w3, b3, a3, u3, 0.25, tm=16, tn=128, tk=128))
    assert out3_v.shape == (M3, out3)
    assert jnp.allclose(out3_v, ref_fn(x3, w3, b3, a3, u3, 0.25), atol=3e-5, rtol=3e-5)

    print("KERNEL_OK")
</pallas_src>

<mosaic_0001>
module attributes {stable_mosaic.version = 11 : i64} {
  func.func @_lora_linear_kernel(%arg0: i32, %arg1: i32, %arg2: i32, %arg3: memref<1xf32, #tpu.memory_space<smem>>, %arg4: memref<16x32xf32, #tpu.memory_space<vmem>>, %arg5: memref<128x32xf32, #tpu.memory_space<vmem>>, %arg6: memref<1x128xf32, #tpu.memory_space<vmem>>, %arg7: memref<4x32xf32, #tpu.memory_space<vmem>>, %arg8: memref<128x4xf32, #tpu.memory_space<vmem>>, %arg9: memref<16x128xf32, #tpu.memory_space<vmem>>, %arg10: memref<16x128xf32, #tpu.memory_space<vmem>>, %arg11: memref<16x4xf32, #tpu.memory_space<vmem>>) attributes {dimension_semantics = [#tpu.dimension_semantics<parallel>, #tpu.dimension_semantics<parallel>, #tpu.dimension_semantics<arbitrary>], iteration_bounds = array<i64: 1, 1, 1>, scalar_prefetch = 0 : i64, scratch_operands = 2 : i64, tpu.core_type = #tpu.core_type<tc>, window_params = [{transform_indices = @transform_0, window_bounds = array<i64: 1>}, {transform_indices = @transform_1, window_bounds = array<i64: 16, 32>}, {transform_indices = @transform_2, window_bounds = array<i64: 128, 32>}, {transform_indices = @transform_3, window_bounds = array<i64: 1, 128>}, {transform_indices = @transform_4, window_bounds = array<i64: 4, 32>}, {transform_indices = @transform_5, window_bounds = array<i64: 128, 4>}, {transform_indices = @transform_6, window_bounds = array<i64: 16, 128>}]} {
    %c0_i32 = arith.constant 0 : i32
    %0 = arith.cmpi eq, %arg2, %c0_i32 : i32
    %1 = arith.extui %0 : i1 to i32
    %c0_i32_0 = arith.constant 0 : i32
    %2 = arith.cmpi ne, %1, %c0_i32_0 : i32
    scf.if %2 {
      %cst_17 = arith.constant 0.000000e+00 : f32
      %17 = vector.broadcast %cst_17 : f32 to vector<16x128xf32>
      %c0_18 = arith.constant 0 : index
      %c0_19 = arith.constant 0 : index
      %18 = vector.load %arg10[%c0_18, %c0_19] : memref<16x128xf32, #tpu.memory_space<vmem>>, vector<16x128xf32>
      tpu.vector_store %arg10[%c0_18, %c0_19], %17 {strides = array<i32>} : memref<16x128xf32, #tpu.memory_space<vmem>>, vector<16x128xf32>,
      %cst_20 = arith.constant 0.000000e+00 : f32
      %19 = vector.broadcast %cst_20 : f32 to vector<16x4xf32>
      %c0_21 = arith.constant 0 : index
      %c0_22 = arith.constant 0 : index
      %20 = vector.load %arg11[%c0_21, %c0_22] : memref<16x4xf32, #tpu.memory_space<vmem>>, vector<16x4xf32>
      tpu.vector_store %arg11[%c0_21, %c0_22], %19 {strides = array<i32>} : memref<16x4xf32, #tpu.memory_space<vmem>>, vector<16x4xf32>,
    } else {
    }
    %c0 = arith.constant 0 : index
    %c0_1 = arith.constant 0 : index
    %3 = vector.load %arg4[%c0, %c0_1] : memref<16x32xf32, #tpu.memory_space<vmem>>, vector<16x32xf32>
    %c0_2 = arith.constant 0 : index
    %c0_3 = arith.constant 0 : index
    %4 = vector.load %arg10[%c0_2, %c0_3] : memref<16x128xf32, #tpu.memory_space<vmem>>, vector<16x128xf32>
    %c0_4 = arith.constant 0 : index
    %c0_5 = arith.constant 0 : index
    %5 = vector.load %arg5[%c0_4, %c0_5] : memref<128x32xf32, #tpu.memory_space<vmem>>, vector<128x32xf32>
    %cst = arith.constant dense<0.000000e+00> : vector<16x128xf32>
    %6 = tpu.matmul %3, %5, %cst {dimension_numbers = #tpu.dot_dimension_numbers<[1], [1], [0], [0], [0, 0, 1, 0], [], []>} : vector<16x32xf32>, vector<128x32xf32>, vector<16x128xf32> -> vector<16x128xf32>
    %7 = arith.addf %4, %6 : vector<16x128xf32>
    %c0_6 = arith.constant 0 : index
    %c0_7 = arith.constant 0 : index
    %8 = vector.load %arg10[%c0_6, %c0_7] : memref<16x128xf32, #tpu.memory_space<vmem>>, vector<16x128xf32>
    tpu.vector_store %arg10[%c0_6, %c0_7], %7 {strides = array<i32>} : memref<16x128xf32, #tpu.memory_space<vmem>>, vector<16x128xf32>,
    %c0_8 = arith.constant 0 : index
    %c0_9 = arith.constant 0 : index
    %9 = vector.load %arg11[%c0_8, %c0_9] : memref<16x4xf32, #tpu.memory_space<vmem>>, vector<16x4xf32>
    %c0_10 = arith.constant 0 : index
    %c0_11 = arith.constant 0 : index
    %10 = vector.load %arg7[%c0_10, %c0_11] : memref<4x32xf32, #tpu.memory_space<vmem>>, vector<4x32xf32>
    %cst_12 = arith.constant dense<0.000000e+00> : vector<16x4xf32>
    %11 = tpu.matmul %3, %10, %cst_12 {dimension_numbers = #tpu.dot_dimension_numbers<[1], [1], [0], [0], [0, 0, 1, 0], [], []>} : vector<16x32xf32>, vector<4x32xf32>, vector<16x4xf32> -> vector<16x4xf32>
    %12 = arith.addf %9, %11 : vector<16x4xf32>
    %c0_13 = arith.constant 0 : index
    %c0_14 = arith.constant 0 : index
    %13 = vector.load %arg11[%c0_13, %c0_14] : memref<16x4xf32, #tpu.memory_space<vmem>>, vector<16x4xf32>
    tpu.vector_store %arg11[%c0_13, %c0_14], %12 {strides = array<i32>} : memref<16x4xf32, #tpu.memory_space<vmem>>, vector<16x4xf32>,
    %c0_i32_15 = arith.constant 0 : i32
    %14 = arith.cmpi eq, %arg2, %c0_i32_15 : i32
    %15 = arith.extui %14 : i1 to i32
    %c0_i32_16 = arith.constant 0 : i32
    %16 = arith.cmpi ne, %15, %c0_i32_16 : i32
    scf.if %16 {
      %c0_17 = arith.constant 0 : index
      %c0_18 = arith.constant 0 : index
      %17 = vector.load %arg11[%c0_17, %c0_18] : memref<16x4xf32, #tpu.memory_space<vmem>>, vector<16x4xf32>
      %c0_19 = arith.constant 0 : index
      %18 = memref.load %arg3[%c0_19] : memref<1xf32, #tpu.memory_space<smem>>
      %19 = vector.broadcast %18 : f32 to vector<16x4xf32>
      %20 = arith.mulf %17, %19 : vector<16x4xf32>
      %c0_20 = arith.constant 0 : index
      %c0_21 = arith.constant 0 : index
      %21 = vector.load %arg8[%c0_20, %c0_21] : memref<128x4xf32, #tpu.memory_space<vmem>>, vector<128x4xf32>
      %cst_22 = arith.constant dense<0.000000e+00> : vector<16x128xf32>
      %22 = tpu.matmul %20, %21, %cst_22 {dimension_numbers = #tpu.dot_dimension_numbers<[1], [1], [0], [0], [0, 0, 1, 0], [], []>} : vector<16x4xf32>, vector<128x4xf32>, vector<16x128xf32> -> vector<16x128xf32>
      %c0_23 = arith.constant 0 : index
      %c0_24 = arith.constant 0 : index
      %23 = vector.load %arg10[%c0_23, %c0_24] : memref<16x128xf32, #tpu.memory_space<vmem>>, vector<16x128xf32>
      %c0_25 = arith.constant 0 : index
      %c0_26 = arith.constant 0 : index
      %24 = vector.load %arg6[%c0_25, %c0_26] : memref<1x128xf32, #tpu.memory_space<vmem>>, vector<1x128xf32>
      %25 = vector.broadcast %24 : vector<1x128xf32> to vector<16x128xf32>
      %26 = arith.addf %23, %25 : vector<16x128xf32>
      %27 = arith.addf %26, %22 : vector<16x128xf32>
      %c0_27 = arith.constant 0 : index
      %c0_28 = arith.constant 0 : index
      %28 = vector.load %arg9[%c0_27, %c0_28] : memref<16x128xf32, #tpu.memory_space<vmem>>, vector<16x128xf32>
      tpu.vector_store %arg9[%c0_27, %c0_28], %27 {strides = array<i32>} : memref<16x128xf32, #tpu.memory_space<vmem>>, vector<16x128xf32>,
    } else {
    }
    return
  }
  func.func @transform_0(%arg0: i32, %arg1: i32, %arg2: i32) -> i32 {
    %c0_i32 = arith.constant 0 : i32
    %c0_i32_0 = arith.constant 0 : i32
    return %c0_i32 : i32
  }
  func.func @transform_1(%arg0: i32, %arg1: i32, %arg2: i32) -> (i32, i32) {
    %c0_i32 = arith.constant 0 : i32
    return %arg1, %arg2 : i32, i32
  }
  func.func @transform_2(%arg0: i32, %arg1: i32, %arg2: i32) -> (i32, i32) {
    %c0_i32 = arith.constant 0 : i32
    return %arg0, %arg2 : i32, i32
  }
  func.func @transform_3(%arg0: i32, %arg1: i32, %arg2: i32) -> (i32, i32) {
    %c0_i32 = arith.constant 0 : i32
    %c0_i32_0 = arith.constant 0 : i32
    return %c0_i32, %arg0 : i32, i32
  }
  func.func @transform_4(%arg0: i32, %arg1: i32, %arg2: i32) -> (i32, i32) {
    %c0_i32 = arith.constant 0 : i32
    %c0_i32_0 = arith.constant 0 : i32
    return %c0_i32, %arg2 : i32, i32
  }
  func.func @transform_5(%arg0: i32, %arg1: i32, %arg2: i32) -> (i32, i32) {
    %c0_i32 = arith.constant 0 : i32
    %c0_i32_0 = arith.constant 0 : i32
    return %arg0, %c0_i32 : i32, i32
  }
  func.func @transform_6(%arg0: i32, %arg1: i32, %arg2: i32) -> (i32, i32) {
    %c0_i32 = arith.constant 0 : i32
    return %arg1, %arg0 : i32, i32
  }
}

</mosaic_0001>

<bundles_post_ra>
// kernel: tpu_custom_call.1
= control target key start
LH: loop header
LB: loop body
LE: loop exit
PB: predicated region body
PF: predicated region fallthrough
CT: control target
= control target key end

     0   :  { %vm54_vm0 = vcmask 261120   ;;  %vm31_vm1 = vcmask 31744   ;;  %s640_s0 = inlined_call_operand.<no memory space> [shape: f32[1], index: 0, kind: input, shape index: {}]   ;;  %s641_s1 = inlined_call_operand.vmem [shape: f32[16,32], index: 1, kind: input, shape index: {}]   ;;  %s642_s2 = inlined_call_operand.vmem [shape: f32[128,32], index: 2, kind: input, shape index: {}]   ;;  %s643_s3 = inlined_call_operand.vmem [shape: f32[1,128], index: 3, kind: input, shape index: {}]   ;;  %s644_s4 = inlined_call_operand.vmem [shape: f32[4,32], index: 4, kind: input, shape index: {}]   ;;  %s645_s5 = inlined_call_operand.vmem [shape: f32[128,4], index: 5, kind: input, shape index: {}]   ;;  %s646_s6 = inlined_call_operand.hbm [shape: f32[16,128], index: 6, kind: output, shape index: {}]  }
   0x1   :  { %v138_v0 = vld [vmem:[%s644_s4] sm:$0xf]  ;;  %v53_v2 = vld [vmem:[%s642_s2 + $0x78] sm:$0xff]  ;;  %v52_v4 = vld [vmem:[%s642_s2 + $0x70] sm:$0xff] }
   0x2   :  { %320 = vmatpush.xpose.msk.msra.mxu1 %vm54_vm0, %v138_v0  ;;  %v450_v1 = vld [vmem:[%s641_s1] sm:$0xff]  ;;  %v194_v3 = vld [vmem:[%s645_s5 + $0x78] sm:$0xff]  ;;  %302 = vmatpush.xpose.msk.msra.mxu0 %vm54_vm0, %v53_v2  ;;  %v193_v5 = vld [vmem:[%s645_s5 + $0x70] sm:$0xff] }
   0x3   :  { %341 = vmatpush.xpose.msk.msra.mxu3 %vm54_vm0, %v53_v2  ;;  %357 = vmatpush.xpose.msk.msra.mxu2 %vm31_vm1, %v194_v3  ;;  %v51_v6 = vld [vmem:[%s642_s2 + $0x68] sm:$0xff] }
   0x4   :  { %v192_v7 = vld [vmem:[%s645_s5 + $0x68] sm:$0xff] }
   0x5   :  { %321 = vmatmul.msk.f32.vlgmr.msra.gmra.mxu1 %vm54_vm0, %v450_v1 }
   0x6   :  { %323 = vmatpush.xpose.msk.msrb.mxu1 %vm31_vm1, %v194_v3  ;;  %303 = vmatpush.xpose.msk.msra.mxu0 %vm54_vm0, %v52_v4 }
   0x7   :  { %342 = vmatpush.xpose.msk.msra.mxu3 %vm54_vm0, %v52_v4  ;;  %358 = vmatpush.xpose.msk.msra.mxu2 %vm31_vm1, %v193_v5 }
   0xa   :  { %324 = vmatpush.xpose.msk.msrb.mxu1 %vm31_vm1, %v193_v5 }
   0xb   :  { %12 = vsyncpa [#allocation6], 0  ;;  %v483_v8 = vld [vmem:[%s641_s1 + $0x8] sm:$0xff]  ;;  %304 = vmatpush.xpose.msk.msra.mxu0 %vm54_vm0, %v51_v6  ;;  %v50_v9 = vld [vmem:[%s642_s2 + $0x60] sm:$0xff]  ;;  %343 = vmatpush.xpose.msk.msra.mxu3 %vm54_vm0, %v51_v6  ;;  %v404_v17 = vmov 0.0   ;;  %v176_v41 = vstv %s640_s0  ;;  %s405_s0 = smov [#allocation5]  }
   0xc   :  { %v191_v10 = vld [vmem:[%s645_s5 + $0x60] sm:$0xff]  ;;  %359 = vmatpush.xpose.msk.msra.mxu2 %vm31_vm1, %v192_v7  ;;  %v49_v11 = vld [vmem:[%s642_s2 + $0x58] sm:$0xff]  ;;  %v48_v13 = vld [vmem:[%s642_s2 + $0x50] sm:$0xff]  ;;  %32 = vst.msk [vmem:[#allocation3] sm:$0xff] %vm31_vm1, %v404_v17  ;;  %s288_s16 = sshll.u32 %s405_s0, 4  ;;  %s290_s18 = sshll.u32 %s646_s6, 4  ;;  %s289_s16 = int_to_ptr.vmem [resolvable:$true] %s288_s16  ;;  %s291_s18 = int_to_ptr.hbm [resolvable:$true] %s290_s18 }
   0xd   :  { %322 = vmatmul.msk.f32.gmra.mxu1 %vm54_vm0, %v483_v8  ;;  %v190_v12 = vld [vmem:[%s645_s5 + $0x58] sm:$0xff]  ;;  %v189_v14 = vld [vmem:[%s645_s5 + $0x50] sm:$0xff]  ;;  %v47_v15 = vld [vmem:[%s642_s2 + $0x48] sm:$0xff]  ;;  %33 = vst.msk [vmem:[#allocation3 + $0x8] sm:$0xff] %vm31_vm1, %v404_v17  ;;  %s406_s19 = smov 128  }
   0xe   :  { %325 = vmatpush.xpose.msk.msrb.mxu1 %vm31_vm1, %v192_v7  ;;  %v188_v16 = vld [vmem:[%s645_s5 + $0x48] sm:$0xff]  ;;  %v46_v18 = vld [vmem:[%s642_s2 + $0x40] sm:$0xff]  ;;  %v45_v20 = vld [vmem:[%s642_s2 + $0x38] sm:$0xff] }
   0xf   :  { %305 = vmatpush.xpose.msk.msra.mxu0 %vm54_vm0, %v50_v9  ;;  %344 = vmatpush.xpose.msk.msra.mxu3 %vm54_vm0, %v50_v9  ;;  %v187_v19 = vld [vmem:[%s645_s5 + $0x40] sm:$0xff]  ;;  %v186_v21 = vld [vmem:[%s645_s5 + $0x38] sm:$0xff]  ;;  %v44_v22 = vld [vmem:[%s642_s2 + $0x30] sm:$0xff] }
  0x10   :  { %360 = vmatpush.xpose.msk.msra.mxu2 %vm31_vm1, %v191_v10  ;;  %v185_v23 = vld [vmem:[%s645_s5 + $0x30] sm:$0xff]  ;;  %v43_v24 = vld [vmem:[%s642_s2 + $0x28] sm:$0xff]  ;;  %v42_v26 = vld [vmem:[%s642_s2 + $0x20] sm:$0xff] }
  0x11   :  { %v184_v25 = vld [vmem:[%s645_s5 + $0x28] sm:$0xff]  ;;  %v183_v27 = vld [vmem:[%s645_s5 + $0x20] sm:$0xff]  ;;  %v41_v28 = vld [vmem:[%s642_s2 + $0x18] sm:$0xff] }
  0x12   :  { %326 = vmatpush.xpose.msk.msrb.mxu1 %vm31_vm1, %v191_v10  ;;  %v182_v29 = vld [vmem:[%s645_s5 + $0x18] sm:$0xff]  ;;  %v40_v30 = vld [vmem:[%s642_s2 + $0x10] sm:$0xff]  ;;  %v39_v32 = vld [vmem:[%s642_s2 + $0x8] sm:$0xff] }
  0x13   :  { %306 = vmatpush.xpose.msk.msra.mxu0 %vm54_vm0, %v49_v11  ;;  %345 = vmatpush.xpose.msk.msra.mxu3 %vm54_vm0, %v49_v11  ;;  %v181_v31 = vld [vmem:[%s645_s5 + $0x10] sm:$0xff]  ;;  %v180_v33 = vld [vmem:[%s645_s5 + $0x8] sm:$0xff]  ;;  %v38_v34 = vld [vmem:[%s642_s2] sm:$0xff] }
  0x14   :  { %361 = vmatpush.xpose.msk.msra.mxu2 %vm31_vm1, %v190_v12  ;;  %v179_v35 = vld [vmem:[%s645_s5] sm:$0xff]  ;;  %v137_v39 = vld [vmem:[#allocation3 + $0x8] sm:$0xff] }
  0x15   :  { %v136_v36 = vld [vmem:[#allocation3] sm:$0xff] }
  0x16   :  { %327 = vmatpush.xpose.msk.msrb.mxu1 %vm31_vm1, %v190_v12  ;;  %v377_v47 = vld [vmem:[%s643_s3] ss:$0 sm:$0xff]  ;;  %s407_s3 = smov 8  }
  0x17   :  { %307 = vmatpush.xpose.msk.msra.mxu0 %vm54_vm0, %v48_v13  ;;  %346 = vmatpush.xpose.msk.msra.mxu3 %vm54_vm0, %v48_v13 }
  0x18   :  { %362 = vmatpush.xpose.msk.msra.mxu2 %vm31_vm1, %v189_v14 }
  0x1a   :  { %328 = vmatpush.xpose.msk.msrb.mxu1 %vm31_vm1, %v189_v14 }
  0x1b   :  { %308 = vmatpush.xpose.msk.msra.mxu0 %vm54_vm0, %v47_v15  ;;  %347 = vmatpush.xpose.msk.msra.mxu3 %vm54_vm0, %v47_v15 }
  0x1c   :  { %363 = vmatpush.xpose.msk.msra.mxu2 %vm31_vm1, %v188_v16 }
  0x1e   :  { %329 = vmatpush.xpose.msk.msrb.mxu1 %vm31_vm1, %v188_v16 }
  0x1f   :  { %309 = vmatpush.xpose.msk.msra.mxu0 %vm54_vm0, %v46_v18  ;;  %348 = vmatpush.xpose.msk.msra.mxu3 %vm54_vm0, %v46_v18 }
  0x20   :  { %364 = vmatpush.xpose.msk.msra.mxu2 %vm31_vm1, %v187_v19 }
  0x22   :  { %330 = vmatpush.xpose.msk.msrb.mxu1 %vm31_vm1, %v187_v19 }
  0x23   :  { %310 = vmatpush.xpose.msk.msra.mxu0 %vm54_vm0, %v45_v20  ;;  %349 = vmatpush.xpose.msk.msra.mxu3 %vm54_vm0, %v45_v20 }
  0x24   :  { %365 = vmatpush.xpose.msk.msra.mxu2 %vm31_vm1, %v186_v21 }
  0x26   :  { %331 = vmatpush.xpose.msk.msrb.mxu1 %vm31_vm1, %v186_v21 }
  0x27   :  { %311 = vmatpush.xpose.msk.msra.mxu0 %vm54_vm0, %v44_v22  ;;  %350 = vmatpush.xpose.msk.msra.mxu3 %vm54_vm0, %v44_v22 }
  0x28   :  { %366 = vmatpush.xpose.msk.msra.mxu2 %vm31_vm1, %v185_v23 }
  0x2a   :  { %332 = vmatpush.xpose.msk.msrb.mxu1 %vm31_vm1, %v185_v23 }
  0x2b   :  { %312 = vmatpush.xpose.msk.msra.mxu0 %vm54_vm0, %v43_v24  ;;  %351 = vmatpush.xpose.msk.msra.mxu3 %vm54_vm0, %v43_v24 }
  0x2c   :  { %367 = vmatpush.xpose.msk.msra.mxu2 %vm31_vm1, %v184_v25 }
  0x2e   :  { %333 = vmatpush.xpose.msk.msrb.mxu1 %vm31_vm1, %v184_v25 }
  0x2f   :  { %313 = vmatpush.xpose.msk.msra.mxu0 %vm54_vm0, %v42_v26  ;;  %352 = vmatpush.xpose.msk.msra.mxu3 %vm54_vm0, %v42_v26 }
  0x30   :  { %368 = vmatpush.xpose.msk.msra.mxu2 %vm31_vm1, %v183_v27 }
  0x32   :  { %334 = vmatpush.xpose.msk.msrb.mxu1 %vm31_vm1, %v183_v27 }
  0x33   :  { %314 = vmatpush.xpose.msk.msra.mxu0 %vm54_vm0, %v41_v28  ;;  %353 = vmatpush.xpose.msk.msra.mxu3 %vm54_vm0, %v41_v28 }
  0x34   :  { %369 = vmatpush.xpose.msk.msra.mxu2 %vm31_vm1, %v182_v29 }
  0x36   :  { %335 = vmatpush.xpose.msk.msrb.mxu1 %vm31_vm1, %v182_v29 }
  0x37   :  { %315 = vmatpush.xpose.msk.msra.mxu0 %vm54_vm0, %v40_v30  ;;  %354 = vmatpush.xpose.msk.msra.mxu3 %vm54_vm0, %v40_v30 }
  0x38   :  { %370 = vmatpush.xpose.msk.msra.mxu2 %vm31_vm1, %v181_v31 }
  0x3a   :  { %336 = vmatpush.xpose.msk.msrb.mxu1 %vm31_vm1, %v181_v31 }
  0x3b   :  { %316 = vmatpush.xpose.msk.msra.mxu0 %vm54_vm0, %v39_v32  ;;  %355 = vmatpush.xpose.msk.msra.mxu3 %vm54_vm0, %v39_v32 }
  0x3c   :  { %371 = vmatpush.xpose.msk.msra.mxu2 %vm31_vm1, %v180_v33 }
  0x3e   :  { %337 = vmatpush.xpose.msk.msrb.mxu1 %vm31_vm1, %v180_v33 }
  0x3f   :  { %317 = vmatpush.xpose.msk.msra.mxu0 %vm54_vm0, %v38_v34  ;;  %356 = vmatpush.xpose.msk.msra.mxu3 %vm54_vm0, %v38_v34 }
  0x40   :  { %372 = vmatpush.xpose.msk.msra.mxu2 %vm31_vm1, %v179_v35 }
  0x42   :  { %338 = vmatpush.xpose.msk.msrb.mxu1 %vm31_vm1, %v179_v35  ;;  %318 = vmatmul.msk.f32.vlgmr.msra.gmra.mxu0 %vm54_vm0, %v450_v1 }
  0x43   :  { %319 = vmatmul.msk.f32.vlgmr.msra.gmra.mxu3 %vm54_vm0, %v483_v8 }
  0x82   :  { %v159_v37 = vpop.f32.mrf.mxu1 }
  0x83   :  { %v165_v38 = vadd.f32 %v159_v37, %v136_v36 }
  0x85   :  { %168 = vst.msk [vmem:[#allocation3] sm:$0xff] %vm31_vm1, %v165_v38 }
  0x8a   :  { %v162_v40 = vpop.f32.mrf.mxu1 }
  0x8b   :  { %v166_v42 = vadd.f32 %v162_v40, %v137_v39 }
  0x8c   :  { %v173_v43 = vld [vmem:[#allocation3] sm:$0xff] }
  0x8d   :  { %169 = vst.msk [vmem:[#allocation3 + $0x8] sm:$0xff] %vm31_vm1, %v166_v42  ;;  %v177_v44 = vmul.f32 %v176_v41, %v173_v43 }
  0x8f   :  { %339 = vmatmul.msk.f32.vlgmr.msrb.gmra.mxu1 %vm31_vm1, %v177_v44 }
  0x94   :  { %v174_v45 = vld [vmem:[#allocation3 + $0x8] sm:$0xff] }
  0x95   :  { %v178_v46 = vmul.f32 %v176_v41, %v174_v45 }
  0x97   :  { %340 = vmatmul.msk.f32.vlgmr.msra.gmra.mxu2 %vm31_vm1, %v178_v46 }
  0xbf   :  { %v126_v48 = vpop.f32.mrf.mxu0 }
  0xc0   :  { %v278_v49 = vadd.f32 %v377_v47, %v126_v48 }
  0xc6   :  { %v129_v52 = vpop.f32.mrf.mxu3 }
  0xc7   :  { %v279_v53 = vadd.f32 %v377_v47, %v129_v52 }
 0x10c   :  { %v266_v50 = vpop.f32.mrf.mxu1 }
 0x10d   :  { %v280_v51 = vadd.f32 %v278_v49, %v266_v50 }
 0x10f   :  { %282 = vst [vmem:[#allocation5] sm:$0xff] %v280_v51 }
 0x11a   :  { %v269_v54 = vpop.f32.mrf.mxu2 }
 0x11b   :  { %v281_v55 = vadd.f32 %v279_v53, %v269_v54 }
 0x11d   :  { %283 = vst [vmem:[#allocation5 + $0x8] sm:$0xff] %v281_v55 }
 0x11e   :  { %296 = dma.vmem_to_hbm [thread:$0]  %s289_s16, 256, %s291_s18, [#allocation6], %s406_s19, %s406_s19, %s407_s3  }
 0x11f   :  { %402 = dma.done.wait [#allocation6], 256  }
 0x120   :  { %403 = vsyncadd [#allocation6], 4294967040 }
 0x121   :  { %301 = vsyncpa [#allocation6], 1 }

</bundles_post_ra>
